<compile_context>
chip_gen: v6e
topology: v6e:2x2x1
jax: 0.10.0
libtpu: 0.0.40
codegen_flags: <defaults>
</compile_context>

<pallas_src>
import jax
import jax.numpy as jnp
from jax.experimental import pallas as pl
from jax.experimental.pallas import tpu as pltpu


def _round_up(x, m):
    return (x + m - 1) // m * m


def _reprogrammer_kernel(x_ref, wp_ref, bp_ref, v_ref, o_ref):
    # x_ref : (TM, D)  query-row tile
    # wp_ref: (D, P)   W' = (Wq @ K^T) * scale   (grid-invariant)
    # bp_ref: (1, P)   b' = (bq @ K^T) * scale
    # v_ref : (P, E)   V  = E' @ Wv + bv
    # o_ref : (TM, E)
    scores = (
        jnp.dot(x_ref[...], wp_ref[...], preferred_element_type=jnp.float32)
        + bp_ref[...]
    )

    # Numerically-stable softmax over the prototype axis.
    m = jnp.max(scores, axis=-1, keepdims=True)
    e = jnp.exp(scores - m)
    denom = jnp.sum(e, axis=-1, keepdims=True)
    # EUP approximate reciprocal + one Newton-Raphson step: f32-accurate,
    # keeps the divide off the VALU critical path.
    inv = pl.reciprocal(denom, approx=True)
    inv = inv * (2.0 - denom * inv)
    weights = e * inv

    attended = jnp.dot(weights, v_ref[...], preferred_element_type=jnp.float32)
    o_ref[...] = attended.astype(o_ref.dtype)


def market_reprogrammer(x_patch, params, *, tile_m=512):
    """x_patch: (B, L, D) float32.  Returns (B, L, embed_dim)."""
    B, L, D = x_patch.shape
    Wq, bq = params["Wq"], params["bq"]
    E_prime, Wk, bk = params["E_prime"], params["Wk"], params["bk"]
    Wv, bv = params["Wv"], params["bv"]
    P, E = E_prime.shape

    # ---- grid-invariant precompute (plain XLA, once per call) ----
    K = E_prime @ Wk + bk                       # (P, E)
    V = (E_prime @ Wv + bv).astype(jnp.float32)  # (P, E)
    scale = 1.0 / jnp.sqrt(jnp.float32(E))
    Wp = ((Wq @ K.T) * scale).astype(jnp.float32)       # (D, P)
    bp = ((bq @ K.T) * scale).reshape(1, P).astype(jnp.float32)  # (1, P)

    # ---- tiling over query rows; pad instead of asserting divisibility ----
    BL = B * L
    tm = min(int(tile_m), _round_up(BL, 8))
    tm = _round_up(tm, 8)
    BL_pad = _round_up(BL, tm)

    x_flat = x_patch.reshape(BL, D).astype(jnp.float32)
    if BL_pad != BL:
        x_flat = jnp.pad(x_flat, ((0, BL_pad - BL), (0, 0)))

    grid = (BL_pad // tm,)

    out_flat = pl.pallas_call(
        _reprogrammer_kernel,
        out_shape=jax.ShapeDtypeStruct((BL_pad, E), x_patch.dtype),
        grid_spec=pltpu.PrefetchScalarGridSpec(
            num_scalar_prefetch=0,
            grid=grid,
            in_specs=[
                pl.BlockSpec((tm, D), lambda i: (i, 0)),   # x tile
                pl.BlockSpec((D, P), lambda i: (0, 0)),    # W'
                pl.BlockSpec((1, P), lambda i: (0, 0)),    # b'
                pl.BlockSpec((P, E), lambda i: (0, 0)),    # V
            ],
            out_specs=pl.BlockSpec((tm, E), lambda i: (i, 0)),
        ),
        compiler_params=pltpu.CompilerParams(
            dimension_semantics=("parallel",),
        ),
    )(x_flat, Wp, bp, V)

    return out_flat[:BL].reshape(B, L, E)


def init_params(key, input_dim, prototype_count=32, embed_dim=128):
    """Deterministic synthetic parameters matching the PyTorch module shapes.

    nn.Linear(in, out) has weight (out, in); we store the transpose (in, out)
    so the math is x @ W + b directly.
    """
    ks = jax.random.split(key, 7)

    def lin(kw, kb, fan_in, fan_out):
        bound = 1.0 / jnp.sqrt(jnp.float32(fan_in))
        W = jax.random.uniform(kw, (fan_in, fan_out), jnp.float32, -bound, bound)
        b = jax.random.uniform(kb, (fan_out,), jnp.float32, -bound, bound)
        return W, b

    E_prime = jax.random.normal(ks[0], (prototype_count, embed_dim), jnp.float32)
    Wq, bq = lin(ks[1], ks[2], input_dim, embed_dim)
    Wk, bk = lin(ks[3], ks[4], embed_dim, embed_dim)
    Wv, bv = lin(ks[5], ks[6], embed_dim, embed_dim)
    return {"E_prime": E_prime, "Wq": Wq, "bq": bq,
            "Wk": Wk, "bk": bk, "Wv": Wv, "bv": bv}


def reference_forward(x_patch, params):
    """Pure-JAX reference mirroring the PyTorch forward."""
    B, L, D = x_patch.shape
    x = x_patch.reshape(B * L, D)
    Q = x @ params["Wq"] + params["bq"]
    K = params["E_prime"] @ params["Wk"] + params["bk"]
    V = params["E_prime"] @ params["Wv"] + params["bv"]
    scores = (Q @ K.T) / jnp.sqrt(jnp.float32(K.shape[-1]))
    w = jax.nn.softmax(scores, axis=-1)
    return (w @ V).reshape(B, L, -1)


if __name__ == "__main__":
    key = jax.random.PRNGKey(0)
    k_x, k_p = jax.random.split(key)

    B, L, input_dim = 2, 8, 32          # X_patch: (B, L, D)
    prototype_count, embed_dim = 32, 128

    x_patch = jax.random.normal(k_x, (B, L, input_dim), jnp.float32)
    params = init_params(k_p, input_dim, prototype_count, embed_dim)

    out = market_reprogrammer(x_patch, params)
    out = jax.block_until_ready(out)

    ref = reference_forward(x_patch, params)
    assert out.shape == (B, L, embed_dim)
    assert jnp.allclose(out, ref, atol=1e-3, rtol=1e-3), "mismatch vs reference"

    print("KERNEL_OK")
</pallas_src>

<mosaic_0001>
module attributes {stable_mosaic.version = 11 : i64} {
  func.func @_reprogrammer_kernel(%arg0: i32, %arg1: memref<16x32xf32, #tpu.memory_space<vmem>>, %arg2: memref<32x32xf32, #tpu.memory_space<vmem>>, %arg3: memref<1x32xf32, #tpu.memory_space<vmem>>, %arg4: memref<32x128xf32, #tpu.memory_space<vmem>>, %arg5: memref<16x128xf32, #tpu.memory_space<vmem>>) attributes {dimension_semantics = [#tpu.dimension_semantics<parallel>], iteration_bounds = array<i64: 1>, scalar_prefetch = 0 : i64, scratch_operands = 0 : i64, tpu.core_type = #tpu.core_type<tc>, window_params = [{transform_indices = @transform_0, window_bounds = array<i64: 16, 32>}, {pipeline_mode = #tpu.pipeline_mode<synchronous>, transform_indices = @transform_1, window_bounds = array<i64: 32, 32>}, {pipeline_mode = #tpu.pipeline_mode<synchronous>, transform_indices = @transform_2, window_bounds = array<i64: 1, 32>}, {pipeline_mode = #tpu.pipeline_mode<synchronous>, transform_indices = @transform_3, window_bounds = array<i64: 32, 128>}, {transform_indices = @transform_4, window_bounds = array<i64: 16, 128>}]} {
    %c0 = arith.constant 0 : index
    %c0_0 = arith.constant 0 : index
    %0 = vector.load %arg1[%c0, %c0_0] : memref<16x32xf32, #tpu.memory_space<vmem>>, vector<16x32xf32>
    %c0_1 = arith.constant 0 : index
    %c0_2 = arith.constant 0 : index
    %1 = vector.load %arg2[%c0_1, %c0_2] : memref<32x32xf32, #tpu.memory_space<vmem>>, vector<32x32xf32>
    %cst = arith.constant dense<0.000000e+00> : vector<16x32xf32>
    %2 = tpu.matmul %0, %1, %cst {dimension_numbers = #tpu.dot_dimension_numbers<[1], [0], [0], [1], [0, 0, 1, 1], [], []>} : vector<16x32xf32>, vector<32x32xf32>, vector<16x32xf32> -> vector<16x32xf32>
    %c0_3 = arith.constant 0 : index
    %c0_4 = arith.constant 0 : index
    %3 = vector.load %arg3[%c0_3, %c0_4] : memref<1x32xf32, #tpu.memory_space<vmem>>, vector<1x32xf32>
    %4 = vector.broadcast %3 : vector<1x32xf32> to vector<16x32xf32>
    %5 = arith.addf %2, %4 : vector<16x32xf32>
    %cst_5 = arith.constant dense<0xFF800000> : vector<16xf32>
    %6 = vector.multi_reduction <maximumf>, %5, %cst_5 [1] : vector<16x32xf32> to vector<16xf32>
    %7 = vector.shape_cast %6 : vector<16xf32> to vector<16x1xf32>
    %8 = vector.broadcast %7 : vector<16x1xf32> to vector<16x32xf32>
    %9 = arith.subf %5, %8 : vector<16x32xf32>
    %10 = math.exp %9 : vector<16x32xf32>
    %cst_6 = arith.constant dense<0.000000e+00> : vector<16xf32>
    %11 = vector.multi_reduction <add>, %10, %cst_6 [1] : vector<16x32xf32> to vector<16xf32>
    %12 = vector.shape_cast %11 : vector<16xf32> to vector<16x1xf32>
    %13 = tpu.reciprocal %12 {approx = true} : vector<16x1xf32> -> vector<16x1xf32>
    %14 = arith.mulf %12, %13 : vector<16x1xf32>
    %cst_7 = arith.constant 2.000000e+00 : f32
    %15 = vector.broadcast %cst_7 : f32 to vector<16x1xf32>
    %16 = arith.subf %15, %14 : vector<16x1xf32>
    %17 = arith.mulf %13, %16 : vector<16x1xf32>
    %18 = vector.broadcast %17 : vector<16x1xf32> to vector<16x32xf32>
    %19 = arith.mulf %10, %18 : vector<16x32xf32>
    %c0_8 = arith.constant 0 : index
    %c0_9 = arith.constant 0 : index
    %20 = vector.load %arg4[%c0_8, %c0_9] : memref<32x128xf32, #tpu.memory_space<vmem>>, vector<32x128xf32>
    %cst_10 = arith.constant dense<0.000000e+00> : vector<16x128xf32>
    %21 = tpu.matmul %19, %20, %cst_10 {dimension_numbers = #tpu.dot_dimension_numbers<[1], [0], [0], [1], [0, 0, 1, 1], [], []>} : vector<16x32xf32>, vector<32x128xf32>, vector<16x128xf32> -> vector<16x128xf32>
    %c0_11 = arith.constant 0 : index
    %c0_12 = arith.constant 0 : index
    %22 = vector.load %arg5[%c0_11, %c0_12] : memref<16x128xf32, #tpu.memory_space<vmem>>, vector<16x128xf32>
    tpu.vector_store %arg5[%c0_11, %c0_12], %21 {strides = array<i32>} : memref<16x128xf32, #tpu.memory_space<vmem>>, vector<16x128xf32>,
    return
  }
  func.func @transform_0(%arg0: i32) -> (i32, i32) {
    %c0_i32 = arith.constant 0 : i32
    %c0_i32_0 = arith.constant 0 : i32
    return %arg0, %c0_i32 : i32, i32
  }
  func.func @transform_1(%arg0: i32) -> (i32, i32) {
    %c0_i32 = arith.constant 0 : i32
    %c0_i32_0 = arith.constant 0 : i32
    %c0_i32_1 = arith.constant 0 : i32
    return %c0_i32, %c0_i32_0 : i32, i32
  }
  func.func @transform_2(%arg0: i32) -> (i32, i32) {
    %c0_i32 = arith.constant 0 : i32
    %c0_i32_0 = arith.constant 0 : i32
    %c0_i32_1 = arith.constant 0 : i32
    return %c0_i32, %c0_i32_0 : i32, i32
  }
  func.func @transform_3(%arg0: i32) -> (i32, i32) {
    %c0_i32 = arith.constant 0 : i32
    %c0_i32_0 = arith.constant 0 : i32
    %c0_i32_1 = arith.constant 0 : i32
    return %c0_i32, %c0_i32_0 : i32, i32
  }
  func.func @transform_4(%arg0: i32) -> (i32, i32) {
    %c0_i32 = arith.constant 0 : i32
    %c0_i32_0 = arith.constant 0 : i32
    return %arg0, %c0_i32 : i32, i32
  }
}

</mosaic_0001>

<bundles_post_ra>
// kernel: tpu_custom_call.1
= control target key start
LH: loop header
LB: loop body
LE: loop exit
PB: predicated region body
PF: predicated region fallthrough
CT: control target
= control target key end

     0   :  { %9 = vsyncpa [#allocation3], 0  ;;  %s492_s0 = inlined_call_operand.hbm [shape: f32[16,32], index: 0, kind: input, shape index: {}]   ;;  %s493_s1 = inlined_call_operand.hbm [shape: f32[32,32], index: 1, kind: input, shape index: {}]   ;;  %s494_s2 = inlined_call_operand.vmem [shape: f32[1,32], index: 2, kind: input, shape index: {}]   ;;  %s495_s3 = inlined_call_operand.hbm [shape: f32[32,128], index: 3, kind: input, shape index: {}]   ;;  %s496_s4 = inlined_call_operand.hbm [shape: f32[16,128], index: 4, kind: output, shape index: {}]  }
   0x1   :  { %10 = vsyncpa [#allocation6], 0 }
   0x2   :  { %11 = vsyncpa [#allocation4], 0  ;;  %s426_s15 = smov [#allocation5]   ;;  %s427_s17 = smov [#allocation2]  }
   0x3   :  { %s29_s16 = sshll.u32 %s426_s15, 4  ;;  %s17_s18 = sshll.u32 %s427_s17, 4  ;;  %s30_s16 = int_to_ptr.vmem [resolvable:$true] %s29_s16  ;;  %s18_s18 = int_to_ptr.vmem [resolvable:$true] %s17_s18 }
   0x4   :  { %s348_s19 = scalar_lea.vmem %s30_s16, 512  ;;  %p353_p1 = scmp.lt.s32.totalorder %s30_s16, %s30_s16 }
   0x5   :  { %p349_p0 = scmp.ne.s32.totalorder %s30_s16, %s348_s19  ;;  %p354_p2 = scmp.lt.s32.totalorder %s348_s19, %s348_s19 }
   0x7   :  { %p355_p3 = por %p354_p2, %p353_p1 }
   0x9   :  { %p356_p4 = pnand %p355_p3, %p349_p0 }
   0xb   :  { %359 = shalt.err (!%p356_p4)
}
   0xc   :  { %s428_s20 = smov 128   ;;  %s429_s21 = smov 8  }
   0xd   :  { %35 = dma.hbm_to_vmem [thread:$0]  %s493_s1, 512, %s30_s16, [#allocation6], %s428_s20, %s428_s20, %s429_s21  }
   0xe   :  { %s368_s24 = scalar_lea.vmem %s18_s18, 256  ;;  %p373_p6 = scmp.lt.s32.totalorder %s18_s18, %s18_s18 }
   0xf   :  { %p369_p5 = scmp.ne.s32.totalorder %s18_s18, %s368_s24  ;;  %p374_p7 = scmp.lt.s32.totalorder %s368_s24, %s368_s24 }
  0x11   :  { %p375_p8 = por %p374_p7, %p373_p6 }
  0x13   :  { %p376_p9 = pnand %p375_p8, %p369_p5 }
  0x15   :  { %379 = shalt.err (!%p376_p9)
}
  0x16   :  { %23 = dma.hbm_to_vmem [thread:$0]  %s492_s0, 256, %s18_s18, [#allocation3], %s428_s20, %s428_s20, %s429_s21  }
  0x17   :  { %s430_s27 = smov [#allocation7]  }
  0x18   :  { %s43_s28 = sshll.u32 %s430_s27, 4  ;;  %s44_s28 = int_to_ptr.vmem [resolvable:$true] %s43_s28 }
  0x19   :  { %s388_s29 = scalar_lea.vmem %s44_s28, 512  ;;  %p393_p11 = scmp.lt.s32.totalorder %s44_s28, %s44_s28 }
  0x1a   :  { %p389_p10 = scmp.ne.s32.totalorder %s44_s28, %s388_s29  ;;  %p394_p12 = scmp.lt.s32.totalorder %s388_s29, %s388_s29 }
  0x1c   :  { %p395_p13 = por %p394_p12, %p393_p11 }
  0x1e   :  { %p396_p0 = pnand %p395_p13, %p389_p10 }
  0x20   :  { %399 = shalt.err (!%p396_p0)
}
  0x21   :  { %49 = dma.hbm_to_vmem [thread:$0]  %s495_s3, 512, %s44_s28, [#allocation6], %s428_s20, %s428_s20, %s429_s21  }
  0x22   :  { %420 = dma.done.wait [#allocation3], 256  }
  0x23   :  { %421 = vsyncadd [#allocation3], 4294967040 }
  0x24   :  { %422 = dma.done.wait [#allocation6], 1024  }
  0x25   :  { %423 = vsyncadd [#allocation6], 4294966272  ;;  %vm72_vm0 = vcmask 261120   ;;  %v64_v0 = vld [vmem:[#allocation5 + $0x18] sm:$0xff]  ;;  %v63_v1 = vld [vmem:[#allocation5 + $0x10] sm:$0xff] }
  0x26   :  { %304 = vmatprep.subr.mxu0 %v64_v0  ;;  %v59_v2 = vld [vmem:[#allocation2] sm:$0xff]  ;;  %v62_v3 = vld [vmem:[#allocation5 + $0x8] sm:$0xff]  ;;  %v61_v4 = vld [vmem:[#allocation5] sm:$0xff] }
  0x27   :  { %305 = vmatpush3.msra.mxu0 %v64_v0  ;;  %312 = vmatprep.mubr.msk.f32.mxu0 %vm72_vm0, %v59_v2  ;;  %v60_v5 = vld [vmem:[#allocation2 + $0x8] sm:$0xff]  ;;  %v287_v7 = vld [vmem:[%s494_s2] ss:$0 sm:$0xff]  ;;  %v183_v25 = vld [vmem:[#allocation7 + $0x8] sm:$0xff]  ;;  %s431_s2 = smov [#allocation8]  }
  0x28   :  { %306 = vmatprep.subr.mxu0 %v63_v1  ;;  %v185_v23 = vld [vmem:[#allocation7 + $0x18] sm:$0xff]  ;;  %v184_v24 = vld [vmem:[#allocation7 + $0x10] sm:$0xff]  ;;  %v182_v26 = vld [vmem:[#allocation7] sm:$0xff]  ;;  %s274_s5 = sshll.u32 %s431_s2, 4  ;;  %s275_s5 = int_to_ptr.vmem [resolvable:$true] %s274_s5 }
  0x29   :  { %307 = vmatpush3.msra.mxu0 %v63_v1  ;;  %315 = vmatprep.subr.mxu1 %v185_v23  ;;  %s400_s6 = scalar_lea.vmem %s275_s5, 256  ;;  %p405_p2 = scmp.lt.s32.totalorder %s275_s5, %s275_s5 }
  0x2a   :  { %308 = vmatprep.subr.mxu0 %v62_v3  ;;  %316 = vmatpush3.msra.mxu1 %v185_v23  ;;  %p401_p1 = scmp.ne.s32.totalorder %s275_s5, %s400_s6  ;;  %p406_p3 = scmp.lt.s32.totalorder %s400_s6, %s400_s6 }
  0x2b   :  { %309 = vmatpush3.msra.mxu0 %v62_v3  ;;  %317 = vmatprep.subr.mxu1 %v184_v24 }
  0x2c   :  { %310 = vmatprep.subr.mxu0 %v61_v4  ;;  %318 = vmatpush3.msra.mxu1 %v184_v24  ;;  %p407_p4 = por %p406_p3, %p405_p2 }
  0x2d   :  { %311 = vmatpush3.msra.mxu0 %v61_v4  ;;  %319 = vmatprep.subr.mxu1 %v183_v25 }
  0x2e   :  { %313 = vmatmul.mubr.msk.f32.vlgmr.msra.gmra.mxu0 %vm72_vm0, %v60_v5  ;;  %320 = vmatpush3.msra.mxu1 %v183_v25  ;;  %p408_p5 = pnand %p407_p4, %p401_p1 }
  0x2f   :  { %321 = vmatprep.subr.mxu1 %v182_v26 }
  0x30   :  { %322 = vmatpush3.msra.mxu1 %v182_v26 }
  0xee   :  { %v314_v6 = vpop.f32.mrf.mxu0 }
  0xef   :  { %v151_v10 = vadd.f32 %v314_v6, %v287_v7 }
  0xf0   :  { %v145_v8 = vpop.f32.mrf.mxu0 }
  0xf1   :  { %v146_v9 = vadd.f32 %v287_v7, %v145_v8  ;;  %v157_v12 = vsel %vm72_vm0, %v151_v10, -inf }
  0xf3   :  { %v154_v11 = vsel %vm72_vm0, %v146_v9, -inf }
  0xf4   :  { %155 = vmax.xlane.f32.xlu0 %v154_v11 }
  0xf8   :  { %158 = vmax.xlane.f32.xlu0 %v157_v12 }
 0x17d   :  { %v156_v13 = vpop.xlane.xlu0 %155 }
 0x17e   :  { %v160_v14 = vsub.f32 %v146_v9, %v156_v13 }
 0x180   :  { %v162_v15 = vmul.f32 1.442695, %v160_v14 }
 0x181   :  { %v159_v16 = vpop.xlane.xlu0 %158 }
 0x182   :  { %332 = vpow2.f32 %v162_v15  ;;  %v161_v17 = vsub.f32 %v151_v10, %v159_v16 }
 0x184   :  { %v164_v18 = vmul.f32 1.442695, %v161_v17 }
 0x186   :  { %334 = vpow2.f32 %v164_v18 }
 0x18f   :  { %v333_v19 = vpop.eup %332 }
 0x190   :  { %v166_v20 = vsel %vm72_vm0, %v333_v19, 0.0 }
 0x191   :  { %167 = vadd.xlane.f32.xlu1 %v166_v20 }
 0x193   :  { %v335_v21 = vpop.eup %334 }
 0x194   :  { %v169_v22 = vsel %vm72_vm0, %v335_v21, 0.0 }
 0x195   :  { %170 = vadd.xlane.f32.xlu1 %v169_v22 }
 0x21a   :  { %v168_v27 = vpop.xlane.xlu1 %167 }
 0x21b   :  { %336 = vrcp.f32 %v168_v27 }
 0x21e   :  { %v171_v28 = vpop.xlane.xlu1 %170 }
 0x21f   :  { %338 = vrcp.f32 %v171_v28 }
 0x228   :  { %v337_v29 = vpop.eup %336 }
 0x229   :  { %v174_v30 = vmul.f32 %v337_v29, %v168_v27 }
 0x22b   :  { %v176_v31 = vsub.f32 2.0, %v174_v30 }
 0x22c   :  { %v339_v32 = vpop.eup %338 }
 0x22d   :  { %v175_v33 = vmul.f32 %v339_v32, %v171_v28  ;;  %v178_v34 = vmul.f32 %v337_v29, %v176_v31 }
 0x22f   :  { %v177_v35 = vsub.f32 2.0, %v175_v33  ;;  %v180_v36 = vmul.f32 %v333_v19, %v178_v34 }
 0x231   :  { %v179_v37 = vmul.f32 %v339_v32, %v177_v35  ;;  %323 = vmatprep.mubr.msk.f32.mxu1 %vm72_vm0, %v180_v36 }
 0x233   :  { %v181_v38 = vmul.f32 %v335_v21, %v179_v37 }
 0x235   :  { %324 = vmatmul.mubr.msk.f32.vlgmr.msra.gmra.mxu1 %vm72_vm0, %v181_v38 }
 0x2f5   :  { %v325_v39 = vpop.f32.mrf.mxu1 }
 0x2f6   :  { %268 = vst [vmem:[#allocation8 + $0x8] sm:$0xff] %v325_v39 }
 0x2f7   :  { %v258_v40 = vpop.f32.mrf.mxu1 }
 0x2f8   :  { %267 = vst [vmem:[#allocation8] sm:$0xff] %v258_v40 }
 0x2f9   :  { %411 = shalt.err (!%p408_p5)
}
 0x2fa   :  { %280 = dma.vmem_to_hbm [thread:$0]  %s275_s5, 256, %s496_s4, [#allocation4], %s428_s20, %s428_s20, %s429_s21  }
 0x2fb   :  { %424 = dma.done.wait [#allocation4], 256  }
 0x2fc   :  { %425 = vsyncadd [#allocation4], 4294967040 }
 0x2fd   :  { %284 = vsyncpa [#allocation3], 1 }
 0x2fe   :  { %285 = vsyncpa [#allocation6], 1 }
 0x2ff   :  { %286 = vsyncpa [#allocation4], 1 }

</bundles_post_ra>
